<compile_context>
chip_gen: v6e
topology: v6e:2x2x1
jax: 0.10.0
libtpu: 0.0.40
codegen_flags: <defaults>
</compile_context>

<pallas_src>
import functools

import jax
import jax.numpy as jnp
import numpy as np
from jax.experimental import pallas as pl
from jax.experimental.pallas import tpu as pltpu


def _round_up(x, m):
    return ((x + m - 1) // m) * m


def _ldam_partial_kernel(x_ref, tgt_ref, m_ref, w_ref, num_ref, den_ref, *,
                         s, tn, n_total):
    """Per-tile partial sums of the weighted NLL for LDAM loss.

    x_ref:   (TN, C) logits tile
    tgt_ref: (TN, 1) int32 targets
    m_ref:   (1, C)  per-class margins
    w_ref:   (1, C)  per-class CE weights
    num_ref / den_ref: (1, 8, 128) f32 partials (scalar broadcast over tile)
    """
    x = x_ref[...].astype(jnp.float32)
    tgt = tgt_ref[...]
    m = m_ref[...].astype(jnp.float32)
    w = w_ref[...].astype(jnp.float32)

    t_rows, c = x.shape
    col = jax.lax.broadcasted_iota(jnp.int32, (t_rows, c), 1)
    onehot = col == tgt                                     # scatter_(1, target, 1)

    # Rows past n_total (only in the last, possibly partial tile) are padding.
    row = pl.program_id(0) * tn + jax.lax.broadcasted_iota(
        jnp.int32, (t_rows, 1), 0)
    valid = row < n_total                                   # (TN, 1)

    # where(onehot, x - m[target], x) == x - where(onehot, m, 0): one fewer
    # cross-lane reduction than the batch_m formulation.
    z = s * (x - jnp.where(onehot, m, 0.0))
    z = jnp.where(valid, z, 0.0)          # keep padded-row garbage finite

    # cross_entropy(z, target, weight) pieces (stable log-softmax).
    zmax = jnp.max(z, axis=1, keepdims=True)
    lse = jnp.log(jnp.sum(jnp.exp(z - zmax), axis=1, keepdims=True)) + zmax
    z_t = jnp.sum(jnp.where(onehot, z, 0.0), axis=1, keepdims=True)
    nll = lse - z_t                                         # (TN, 1)
    w_t = jnp.sum(jnp.where(onehot, w, 0.0), axis=1, keepdims=True)
    w_t = jnp.where(valid, w_t, 0.0)      # padded rows contribute nothing

    num = jnp.sum(w_t * nll)              # weighted NLL sum for this tile
    den = jnp.sum(w_t)                    # weight sum for this tile
    num_ref[...] = jnp.broadcast_to(num, num_ref.shape).astype(jnp.float32)
    den_ref[...] = jnp.broadcast_to(den, den_ref.shape).astype(jnp.float32)


def ldam_loss(x, target, m_list, weight=None, s=30.0, tn=256):
    """LDAM loss. x: (N, C) float, target: (N,) int, m_list: (C,) float."""
    n, c = x.shape
    if weight is None:
        weight = jnp.ones((c,), jnp.float32)   # unweighted mean == all-ones weights

    # Batch tile: multiple of 8 (sublane), clamped so tiny batches are one tile.
    tn = min(tn, _round_up(n, 8))
    tn = max(8, _round_up(tn, 8))
    grid_n = pl.cdiv(n, tn)

    tgt2d = target.astype(jnp.int32).reshape(n, 1)
    m2d = m_list.astype(jnp.float32).reshape(1, c)
    w2d = weight.astype(jnp.float32).reshape(1, c)

    kernel = functools.partial(_ldam_partial_kernel, s=float(s), tn=tn, n_total=n)
    num_part, den_part = pl.pallas_call(
        kernel,
        out_shape=(jax.ShapeDtypeStruct((grid_n, 8, 128), jnp.float32),
                   jax.ShapeDtypeStruct((grid_n, 8, 128), jnp.float32)),
        grid=(grid_n,),
        in_specs=[
            pl.BlockSpec((tn, c), lambda i: (i, 0)),   # x: streamed, double-buffered
            pl.BlockSpec((tn, 1), lambda i: (i, 0)),   # targets
            pl.BlockSpec((1, c), lambda i: (0, 0)),    # margins (resident)
            pl.BlockSpec((1, c), lambda i: (0, 0)),    # CE weights (resident)
        ],
        out_specs=(pl.BlockSpec((1, 8, 128), lambda i: (i, 0, 0)),
                   pl.BlockSpec((1, 8, 128), lambda i: (i, 0, 0))),
        compiler_params=pltpu.CompilerParams(
            dimension_semantics=("parallel",),          # batch axis is parallel
            vmem_limit_bytes=32 * 1024 * 1024,          # explicit, safe on v5e/v6e/v7x
        ),
    )(x, tgt2d, m2d, w2d)

    # Tiny final reduction in plain JAX (keeps the grid fully parallel).
    return num_part[:, 0, 0].sum() / den_part[:, 0, 0].sum()


def _ldam_loss_ref(x, target, m_list, weight=None, s=30.0):
    """Pure-JAX reference mirroring the PyTorch module forward."""
    n, c = x.shape
    xf = x.astype(jnp.float32)
    onehot = jax.nn.one_hot(target, c, dtype=jnp.float32)
    batch_m = onehot @ m_list.reshape(c, 1)                 # (N, 1) = m_list[target]
    z = s * jnp.where(onehot > 0, xf - batch_m, xf)
    logp = jax.nn.log_softmax(z, axis=1)
    nll = -jnp.sum(onehot * logp, axis=1)
    w = jnp.ones((c,), jnp.float32) if weight is None else weight
    w_t = w[target]
    return jnp.sum(w_t * nll) / jnp.sum(w_t)


if __name__ == "__main__":
    # Small but lane-dense (C = 128); N = 72 is NOT a multiple of the batch
    # tile (32), so the remainder-row masking path is exercised.
    N, C, TN = 72, 128, 32
    key = jax.random.PRNGKey(0)
    kx, kt, kw = jax.random.split(key, 3)

    # Deterministic long-tailed "class counts" -> LDAM margins (module __init__).
    cls_num_list = 1000.0 / np.arange(1, C + 1, dtype=np.float64)
    max_m = 0.5
    m_np = 1.0 / np.sqrt(np.sqrt(cls_num_list))
    m_np = m_np * (max_m / np.max(m_np))
    m_list = jnp.asarray(m_np, dtype=jnp.float32)

    x = jax.random.normal(kx, (N, C), dtype=jnp.float32)
    target = jax.random.randint(kt, (N,), 0, C, dtype=jnp.int32)
    weight = jax.random.uniform(kw, (C,), jnp.float32, 0.5, 1.5)

    # Unweighted (weight=None, the module's default config).
    loss = ldam_loss(x, target, m_list, weight=None, s=30.0, tn=TN)
    jax.block_until_ready(loss)
    ref = _ldam_loss_ref(x, target, m_list, weight=None, s=30.0)
    assert jnp.allclose(loss, ref, rtol=1e-5, atol=1e-5), (loss, ref)

    # Per-class CE weights.
    loss_w = ldam_loss(x, target, m_list, weight=weight, s=30.0, tn=TN)
    jax.block_until_ready(loss_w)
    ref_w = _ldam_loss_ref(x, target, m_list, weight=weight, s=30.0)
    assert jnp.allclose(loss_w, ref_w, rtol=1e-5, atol=1e-5), (loss_w, ref_w)

    print("KERNEL_OK")
</pallas_src>

<mosaic_0001>
module attributes {stable_mosaic.version = 11 : i64} {
  func.func @_ldam_partial_kernel(%arg0: i32, %arg1: memref<32x128xf32, #tpu.memory_space<vmem>>, %arg2: memref<32x1xi32, #tpu.memory_space<vmem>>, %arg3: memref<1x128xf32, #tpu.memory_space<vmem>>, %arg4: memref<1x128xf32, #tpu.memory_space<vmem>>, %arg5: memref<1x8x128xf32, #tpu.memory_space<vmem>>, %arg6: memref<1x8x128xf32, #tpu.memory_space<vmem>>) attributes {dimension_semantics = [#tpu.dimension_semantics<parallel>], iteration_bounds = array<i64: 3>, scalar_prefetch = 0 : i64, scratch_operands = 0 : i64, tpu.core_type = #tpu.core_type<tc>, window_params = [{transform_indices = @transform_0, window_bounds = array<i64: 32, 128>}, {transform_indices = @transform_1, window_bounds = array<i64: 32, 1>}, {pipeline_mode = #tpu.pipeline_mode<synchronous>, transform_indices = @transform_2, window_bounds = array<i64: 1, 128>}, {pipeline_mode = #tpu.pipeline_mode<synchronous>, transform_indices = @transform_3, window_bounds = array<i64: 1, 128>}, {transform_indices = @transform_4, window_bounds = array<i64: 1, 8, 128>}, {transform_indices = @transform_5, window_bounds = array<i64: 1, 8, 128>}]} {
    %c0 = arith.constant 0 : index
    %c0_0 = arith.constant 0 : index
    %0 = vector.load %arg1[%c0, %c0_0] : memref<32x128xf32, #tpu.memory_space<vmem>>, vector<32x128xf32>
    %c0_1 = arith.constant 0 : index
    %c0_2 = arith.constant 0 : index
    %1 = vector.load %arg2[%c0_1, %c0_2] : memref<32x1xi32, #tpu.memory_space<vmem>>, vector<32x1xi32>
    %c0_3 = arith.constant 0 : index
    %c0_4 = arith.constant 0 : index
    %2 = vector.load %arg3[%c0_3, %c0_4] : memref<1x128xf32, #tpu.memory_space<vmem>>, vector<1x128xf32>
    %c0_5 = arith.constant 0 : index
    %c0_6 = arith.constant 0 : index
    %3 = vector.load %arg4[%c0_5, %c0_6] : memref<1x128xf32, #tpu.memory_space<vmem>>, vector<1x128xf32>
    %4 = tpu.iota {dimensions = array<i32: 1>} : vector<32x128xi32>
    %5 = vector.broadcast %1 : vector<32x1xi32> to vector<32x128xi32>
    %6 = arith.cmpi eq, %4, %5 : vector<32x128xi32>
    %c32_i32 = arith.constant 32 : i32
    %7 = arith.muli %arg0, %c32_i32 : i32
    %8 = tpu.iota {dimensions = array<i32: 0>} : vector<32x1xi32>
    %9 = vector.broadcast %7 : i32 to vector<32x1xi32>
    %10 = arith.addi %9, %8 : vector<32x1xi32>
    %c72_i32 = arith.constant 72 : i32
    %11 = vector.broadcast %c72_i32 : i32 to vector<32x1xi32>
    %12 = arith.cmpi slt, %10, %11 : vector<32x1xi32>
    %cst = arith.constant 0.000000e+00 : f32
    %13 = vector.shape_cast %2 : vector<1x128xf32> to vector<1x128xf32>
    %14 = vector.broadcast %13 : vector<1x128xf32> to vector<32x128xf32>
    %15 = vector.broadcast %cst : f32 to vector<32x128xf32>
    %16 = arith.select %6, %14, %15 : vector<32x128xi1>, vector<32x128xf32>
    %17 = arith.subf %0, %16 : vector<32x128xf32>
    %cst_7 = arith.constant 3.000000e+01 : f32
    %18 = vector.broadcast %cst_7 : f32 to vector<32x128xf32>
    %19 = arith.mulf %18, %17 : vector<32x128xf32>
    %cst_8 = arith.constant 0.000000e+00 : f32
    %20 = vector.shape_cast %12 : vector<32x1xi1> to vector<32x1xi1>
    %21 = vector.broadcast %20 : vector<32x1xi1> to vector<32x128xi1>
    %22 = vector.broadcast %cst_8 : f32 to vector<32x128xf32>
    %23 = arith.select %21, %19, %22 : vector<32x128xi1>, vector<32x128xf32>
    %cst_9 = arith.constant dense<0xFF800000> : vector<32xf32>
    %24 = vector.multi_reduction <maximumf>, %23, %cst_9 [1] : vector<32x128xf32> to vector<32xf32>
    %25 = vector.shape_cast %24 : vector<32xf32> to vector<32x1xf32>
    %26 = vector.broadcast %25 : vector<32x1xf32> to vector<32x128xf32>
    %27 = arith.subf %23, %26 : vector<32x128xf32>
    %28 = math.exp %27 : vector<32x128xf32>
    %cst_10 = arith.constant dense<0.000000e+00> : vector<32xf32>
    %29 = vector.multi_reduction <add>, %28, %cst_10 [1] : vector<32x128xf32> to vector<32xf32>
    %30 = vector.shape_cast %29 : vector<32xf32> to vector<32x1xf32>
    %31 = math.log %30 : vector<32x1xf32>
    %32 = arith.addf %31, %25 : vector<32x1xf32>
    %cst_11 = arith.constant 0.000000e+00 : f32
    %33 = vector.broadcast %cst_11 : f32 to vector<32x128xf32>
    %34 = arith.select %6, %23, %33 : vector<32x128xi1>, vector<32x128xf32>
    %cst_12 = arith.constant dense<0.000000e+00> : vector<32xf32>
    %35 = vector.multi_reduction <add>, %34, %cst_12 [1] : vector<32x128xf32> to vector<32xf32>
    %36 = vector.shape_cast %35 : vector<32xf32> to vector<32x1xf32>
    %37 = arith.subf %32, %36 : vector<32x1xf32>
    %cst_13 = arith.constant 0.000000e+00 : f32
    %38 = vector.shape_cast %3 : vector<1x128xf32> to vector<1x128xf32>
    %39 = vector.broadcast %38 : vector<1x128xf32> to vector<32x128xf32>
    %40 = vector.broadcast %cst_13 : f32 to vector<32x128xf32>
    %41 = arith.select %6, %39, %40 : vector<32x128xi1>, vector<32x128xf32>
    %cst_14 = arith.constant dense<0.000000e+00> : vector<32xf32>
    %42 = vector.multi_reduction <add>, %41, %cst_14 [1] : vector<32x128xf32> to vector<32xf32>
    %43 = vector.shape_cast %42 : vector<32xf32> to vector<32x1xf32>
    %cst_15 = arith.constant 0.000000e+00 : f32
    %44 = vector.broadcast %cst_15 : f32 to vector<32x1xf32>
    %45 = arith.select %12, %43, %44 : vector<32x1xi1>, vector<32x1xf32>
    %46 = arith.mulf %45, %37 : vector<32x1xf32>
    %47 = vector.shape_cast %46 : vector<32x1xf32> to vector<1x32x1xf32>
    %cst_16 = arith.constant dense<0.000000e+00> : vector<1xf32>
    %48 = vector.multi_reduction <add>, %47, %cst_16 [1, 2] : vector<1x32x1xf32> to vector<1xf32>
    %49 = vector.shape_cast %48 : vector<1xf32> to vector<1x1x1xf32>
    %50 = vector.extract %49[0, 0, 0] : f32 from vector<1x1x1xf32>
    %51 = vector.shape_cast %45 : vector<32x1xf32> to vector<1x32x1xf32>
    %cst_17 = arith.constant dense<0.000000e+00> : vector<1xf32>
    %52 = vector.multi_reduction <add>, %51, %cst_17 [1, 2] : vector<1x32x1xf32> to vector<1xf32>
    %53 = vector.shape_cast %52 : vector<1xf32> to vector<1x1x1xf32>
    %54 = vector.extract %53[0, 0, 0] : f32 from vector<1x1x1xf32>
    %55 = vector.broadcast %50 : f32 to vector<1x8x128xf32>
    %c0_18 = arith.constant 0 : index
    %c0_19 = arith.constant 0 : index
    %c0_20 = arith.constant 0 : index
    %56 = vector.load %arg5[%c0_18, %c0_19, %c0_20] : memref<1x8x128xf32, #tpu.memory_space<vmem>>, vector<1x8x128xf32>
    tpu.vector_store %arg5[%c0_18, %c0_19, %c0_20], %55 {strides = array<i32>} : memref<1x8x128xf32, #tpu.memory_space<vmem>>, vector<1x8x128xf32>,
    %57 = vector.broadcast %54 : f32 to vector<1x8x128xf32>
    %c0_21 = arith.constant 0 : index
    %c0_22 = arith.constant 0 : index
    %c0_23 = arith.constant 0 : index
    %58 = vector.load %arg6[%c0_21, %c0_22, %c0_23] : memref<1x8x128xf32, #tpu.memory_space<vmem>>, vector<1x8x128xf32>
    tpu.vector_store %arg6[%c0_21, %c0_22, %c0_23], %57 {strides = array<i32>} : memref<1x8x128xf32, #tpu.memory_space<vmem>>, vector<1x8x128xf32>,
    return
  }
  func.func @transform_0(%arg0: i32) -> (i32, i32) {
    %c0_i32 = arith.constant 0 : i32
    %c0_i32_0 = arith.constant 0 : i32
    return %arg0, %c0_i32 : i32, i32
  }
  func.func @transform_1(%arg0: i32) -> (i32, i32) {
    %c0_i32 = arith.constant 0 : i32
    %c0_i32_0 = arith.constant 0 : i32
    return %arg0, %c0_i32 : i32, i32
  }
  func.func @transform_2(%arg0: i32) -> (i32, i32) {
    %c0_i32 = arith.constant 0 : i32
    %c0_i32_0 = arith.constant 0 : i32
    %c0_i32_1 = arith.constant 0 : i32
    return %c0_i32, %c0_i32_0 : i32, i32
  }
  func.func @transform_3(%arg0: i32) -> (i32, i32) {
    %c0_i32 = arith.constant 0 : i32
    %c0_i32_0 = arith.constant 0 : i32
    %c0_i32_1 = arith.constant 0 : i32
    return %c0_i32, %c0_i32_0 : i32, i32
  }
  func.func @transform_4(%arg0: i32) -> (i32, i32, i32) {
    %c0_i32 = arith.constant 0 : i32
    %c0_i32_0 = arith.constant 0 : i32
    %c0_i32_1 = arith.constant 0 : i32
    return %arg0, %c0_i32, %c0_i32_0 : i32, i32, i32
  }
  func.func @transform_5(%arg0: i32) -> (i32, i32, i32) {
    %c0_i32 = arith.constant 0 : i32
    %c0_i32_0 = arith.constant 0 : i32
    %c0_i32_1 = arith.constant 0 : i32
    return %arg0, %c0_i32, %c0_i32_0 : i32, i32, i32
  }
}

</mosaic_0001>

<bundles_post_ra>
// kernel: tpu_custom_call.1
= control target key start
LH: loop header
LB: loop body
LE: loop exit
PB: predicated region body
PF: predicated region fallthrough
CT: control target
= control target key end

     0   :  { %11 = vsyncpa [#allocation3], 0  ;;  %s1072_s0 = inlined_call_operand.vmem [shape: f32[72,128], index: 0, kind: input, shape index: {}]   ;;  %s1073_s1 = inlined_call_operand.vmem [shape: s32[72,1], index: 1, kind: input, shape index: {}]   ;;  %s1074_s2 = inlined_call_operand.vmem [shape: f32[1,128], index: 2, kind: input, shape index: {}]   ;;  %s1075_s3 = inlined_call_operand.vmem [shape: f32[1,128], index: 3, kind: input, shape index: {}]   ;;  %s1076_s4 = inlined_call_operand.hbm [shape: f32[3,8,128], index: 4, kind: output, shape index: {0}]   ;;  %s1077_s5 = inlined_call_operand.hbm [shape: f32[3,8,128], index: 5, kind: output, shape index: {1}]  }
   0x1   :  { %13 = vsyncpa [#allocation3 + $0x1], 0 }
   0x2   :  { %14 = vsyncpa [#allocation5], 0 }
   0x3   :  { %16 = vsyncpa [#allocation5 + $0x1], 0  ;;  %s836_s18 = smov 0   ;;  %s838_s19 = smov 0  }
   0x4   :  { %s840_s20 = smov 0   ;;  %s842_s21 = smov 0  }
   0x5 LB: > { %s857_s22 = sadd.s32 4294967295, %s801_s21   ;;  %s625_s23 = sadd.s32 4294967294, %s801_s21   ;;  %s801_s21 = sphi %s842_s21, %s1083_s21   ;;  %s797_s20 = sphi %s840_s20, %s1082_s20   ;;  %s793_s19 = sphi %s838_s19, %s1081_s19   ;;  %s789_s18 = sphi %s836_s18, %s1080_s18  }
   0x6   : > { %s861_s24 = sadd.s32 1, %s801_s21   ;;  %s123_s25 = sadd.s32 1, %s797_s20 }
   0x7   : > { %s120_s26 = ssub.s32 %s801_s21, %s861_s24  ;;  %p133_p0 = scmp.ne.s32.totalorder %s797_s20, %s793_s19 }
   0x8   : > { %p121_p1 = scmp.eq.s32.totalorder %s120_s26, 0  ;;  %p134_p2 = scmp.eq.s32.totalorder %s857_s22, 2 }
   0x9   : > { %p139_p3 = scmp.ne.s32.totalorder %s793_s19, %s789_s18  ;;  %p140_p4 = scmp.eq.s32.totalorder %s625_s23, 2 }
   0xa   : > { %s872_s27 = scalar_select %p121_p1, %s797_s20, %s123_s25  }
   0xb   : > { %p874_p5 = por %p134_p2, %p133_p0  ;;  %p878_p6 = por %p140_p4, %p139_p3 }
   0xc   : > { %p628_p7 = scmp.ge.s32.totalorder %s801_s21, 1  ;;  %p224_p8 = scmp.lt.s32.totalorder %s801_s21, 4 }
   0xe   : > { %p225_p9 = pnand %p628_p7, %p224_p8 }
   0xf   : > { %s631_s30 = sshll.u32 (!%p225_p9), %s857_s22, 2  ;;  %s635_s10 = sshll.u32 (!%p225_p9), %s857_s22, 5 }
  0x10   : > { %228 = sbr.rel (%p225_p9) target bundleno = 720 (0x2d0), region = 36  ;;  %p275_p10 = scmp.lt.s32.totalorder (!%p225_p9), %s631_s30, 8 }
  0x11   : > { %s995_s23 = sand.u32 (!%p225_p9), 1, %s793_s19   ;;  %s640_s8 = sshll.u32 (!%p225_p9), %s857_s22, 7 }
  0x12   : > { %s629_s25 = sshll.u32 (!%p225_p9), %s995_s23, 3  ;;  %s1004_s11 = scalar_lea.hbm (!%p225_p9), %s1076_s4, %s640_s8 }
  0x13   : > { %s269_s26 = scalar_lea.vmem (!%p225_p9), [#allocation4], %s629_s25  ;;  %s1011_s16 = scalar_lea.hbm (!%p225_p9), %s1077_s5, %s640_s8 }
  0x14   : > { %s491_s22 = scalar_lea.sflag (!%p225_p9), [#allocation3], %s995_s23 }
  0x15   : > { %v803_v0 = vmov 0   ;;  %s1085_s30 = smov (!%p275_p10, %s631_s30), 8  ;;  %v308_v5 = vlaneseq  ;;  %v332_v8 = vstv %s635_s10  ;;  %v636_v9 = vld [vmem:[%s1074_s2] ss:$0 sm:$0xff]  ;;  %vm453_vm8 = vcmask 7168  }
  0x16   : > { %694 = vset.pattern.permute.xlu1 %v803_v0  ;;  %693 = vset.pattern.permute.xlu0 %v803_v0  ;;  %s632_s6 = sshll.u32 %s1085_s30, 3  ;;  %v637_v58 = vld [vmem:[%s1075_s3] ss:$0 sm:$0xff]  ;;  %s522_s30 = sshll.u32 %s269_s26, 4  ;;  %s999_s30 = int_to_ptr.vmem [resolvable:$true] %s522_s30 }
  0x17   : > { %s292_s9 = scalar_lea.vmem %s1073_s1, %s632_s6  ;;  %v328_v6 = vshrl.u32 %v308_v5, 7  ;;  %s278_s13 = scalar_lea.vmem %s1072_s0, %s632_s6  ;;  %v892_v7 = vand.u32 127, %v308_v5 }
  0x18   : > { %v304_v1 = vld [vmem:[%s292_s9 + $0x10] sm:$0xff]  ;;  %v302_v2 = vld [vmem:[%s292_s9] sm:$0xff]  ;;  %v305_v3 = vld [vmem:[%s292_s9 + $0x18] sm:$0xff]  ;;  %s262_s6 = scalar_lea.vmem [#allocation2], %s629_s25  ;;  %s804_s25 = smov [#allocation2]  }
  0x19   : > { %317 = vperm.xlu1 %694, %v304_v1   ;;  %311 = vperm.xlu0 %693, %v302_v2   ;;  %v303_v4 = vld [vmem:[%s292_s9 + $0x8] sm:$0xff]  ;;  %v300_v11 = vld [vmem:[%s278_s13 + $0x10] sm:$0xff]  ;;  %v298_v13 = vld [vmem:[%s278_s13] sm:$0xff]  ;;  %v901_v14 = vadd.s32 %v332_v8, %v328_v6  ;;  %v329_v15 = vadd.s32 8, %v328_v6  ;;  %v330_v16 = vadd.s32 16, %v328_v6  ;;  %v331_v27 = vadd.s32 24, %v328_v6 }
  0x1a   : > { %v301_v22 = vld [vmem:[%s278_s13 + $0x18] sm:$0xff]  ;;  %v299_v24 = vld [vmem:[%s278_s13 + $0x8] sm:$0xff]  ;;  %s509_s7 = sshll.u32 %s262_s6, 4  ;;  %s715_s9 = sshll.u32 %s804_s25, 4  ;;  %s1006_s7 = int_to_ptr.vmem [resolvable:$true] %s509_s7  ;;  %s716_s9 = int_to_ptr.vmem [resolvable:$false] %s715_s9 }
  0x1b   : > { %vm337_vm2 = vcmp.lt.s32.totalorder %v901_v14, 72  ;;  %v916_v25 = vadd.s32 %v332_v8, %v329_v15  ;;  %v918_v26 = vadd.s32 %v332_v8, %v330_v16  ;;  %v932_v35 = vadd.s32 %v332_v8, %v331_v27  ;;  %s711_s17 = scalar_lea.vmem %s1006_s7, 128  ;;  %s717_s10 = scalar_lea.vmem %s716_s9, 256 }
  0x1c   : > { %p712_p11 = scmp.ne.s32.totalorder %s1006_s7, %s711_s17  ;;  %p718_p0 = scmp.lt.s32.totalorder %s1006_s7, %s716_s9 }
  0x1d   : > { %320 = vperm.xlu1 %694, %v305_v3   ;;  %314 = vperm.xlu0 %693, %v303_v4   ;;  %vm338_vm5 = vcmp.lt.s32.totalorder %v916_v25, 72  ;;  %vm339_vm6 = vcmp.lt.s32.totalorder %v918_v26, 72  ;;  %vm340_vm7 = vcmp.lt.s32.totalorder %v932_v35, 72  ;;  %p719_p1 = scmp.lt.s32.totalorder %s717_s10, %s711_s17 }
  0x1e   : > { %p713_p12 = pnand %p712_p11, %p874_p5 }
  0x1f   : > { %p720_p2 = por %p719_p1, %p718_p0 }
  0x20   : > { %p714_p13 = pneg %p713_p12 }
  0x22   : > { %p721_p3 = pnand %p720_p2, %p714_p13 }
  0x94   : > { %v897_v10 = vpop.permute.xlu1 %317  ;;  %v899_v12 = vpop.permute.xlu0 %311 }
  0x95   : > { %vm324_vm0 = vcmp.eq.s32.totalorder %v892_v7, %v897_v10  ;;  %vm322_vm1 = vcmp.eq.s32.totalorder %v892_v7, %v899_v12 }
  0x96   : > { %v349_v17 = vsel %vm324_vm0, %v636_v9, 0.0  ;;  %v347_v18 = vsel %vm322_vm1, %v636_v9, 0.0  ;;  %v433_v60 = vsel %vm322_vm1, %v637_v58, 0.0  ;;  %v435_v63 = vsel %vm324_vm0, %v637_v58, 0.0 }
  0x97   : > { %v353_v19 = vsub.f32 %v300_v11, %v349_v17  ;;  %v351_v20 = vsub.f32 %v298_v13, %v347_v18 }
  0x98   : > { %v913_v21 = vpop.permute.xlu1 %320  ;;  %v315_v23 = vpop.permute.xlu0 %314 }
  0x99   : > { %vm325_vm3 = vcmp.eq.s32.totalorder %v892_v7, %v913_v21  ;;  %vm323_vm4 = vcmp.eq.s32.totalorder %v892_v7, %v315_v23  ;;  %v355_v28 = vmul.f32 30.0, %v351_v20  ;;  %v357_v34 = vmul.f32 30.0, %v353_v19 }
  0x9a   : > { %v350_v29 = vsel %vm325_vm3, %v636_v9, 0.0  ;;  %v348_v30 = vsel %vm323_vm4, %v636_v9, 0.0  ;;  %v434_v61 = vsel %vm323_vm4, %v637_v58, 0.0  ;;  %v436_v1 = vsel %vm325_vm3, %v637_v58, 0.0 }
  0x9b   : > { %v354_v31 = vsub.f32 %v301_v22, %v350_v29  ;;  %v352_v32 = vsub.f32 %v299_v24, %v348_v30  ;;  %v367_v33 = vsel %vm337_vm2, %v355_v28, 0.0  ;;  %v369_v38 = vsel %vm339_vm6, %v357_v34, 0.0 }
  0x9c   : > { %371 = vmax.xlane.f32.xlu0 %v367_v33  ;;  %v411_v57 = vsel %vm322_vm1, %v367_v33, 0.0  ;;  %v413_v62 = vsel %vm324_vm0, %v369_v38, 0.0 }
  0x9d   : > { %v356_v36 = vmul.f32 30.0, %v352_v32  ;;  %v358_v39 = vmul.f32 30.0, %v354_v31 }
  0x9f   : > { %v368_v37 = vsel %vm338_vm5, %v356_v36, 0.0  ;;  %v370_v40 = vsel %vm340_vm7, %v358_v39, 0.0 }
  0xa0   : > { %373 = vmax.xlane.f32.xlu1 %v368_v37  ;;  %375 = vmax.xlane.f32.xlu0 %v369_v38  ;;  %v412_v59 = vsel %vm323_vm4, %v368_v37, 0.0  ;;  %v414_v0 = vsel %vm325_vm3, %v370_v40, 0.0 }
  0xa4   : > { %377 = vmax.xlane.f32.xlu0 %v370_v40 }
 0x125   : > { %v372_v41 = vpop.xlane.xlu0 %371 }
 0x126   : > { %v379_v42 = vsub.f32 %v367_v33, %v372_v41 }
 0x128   : > { %v383_v43 = vmul.f32 1.442695, %v379_v42 }
 0x129   : > { %v941_v44 = vpop.xlane.xlu1 %373  ;;  %v943_v45 = vpop.xlane.xlu0 %375 }
 0x12a   : > { %695 = vpow2.f32 %v383_v43  ;;  %v380_v46 = vsub.f32 %v368_v37, %v941_v44  ;;  %v381_v47 = vsub.f32 %v369_v38, %v943_v45 }
 0x12c   : > { %v385_v48 = vmul.f32 1.442695, %v380_v46  ;;  %v387_v49 = vmul.f32 1.442695, %v381_v47 }
 0x12d   : > { %v947_v50 = vpop.xlane.xlu0 %377 }
 0x12e   : > { %697 = vpow2.f32 %v385_v48  ;;  %v382_v51 = vsub.f32 %v370_v40, %v947_v50 }
 0x12f   : > { %699 = vpow2.f32 %v387_v49 }
 0x130   : > { %v389_v52 = vmul.f32 1.442695, %v382_v51 }
 0x132   : > { %701 = vpow2.f32 %v389_v52 }
 0x137   : > { %v696_v53 = vpop.eup %695 }
 0x138   : > { %391 = vadd.xlane.f32.xlu1 %v696_v53 }
 0x13b   : > { %v698_v54 = vpop.eup %697 }
 0x13c   : > { %v700_v55 = vpop.eup %699  ;;  %393 = vadd.xlane.f32.xlu0 %v698_v54 }
 0x13d   : > { %395 = vadd.xlane.f32.xlu1 %v700_v55 }
 0x13f   : > { %v702_v56 = vpop.eup %701 }
 0x140   : > { %397 = vadd.xlane.f32.xlu0 %v702_v56 }
 0x141   : > { %415 = vadd.xlane.f32.xlu1 %v411_v57 }
 0x144   : > { %417 = vadd.xlane.f32.xlu0 %v412_v59 }
 0x145   : > { %437 = vadd.xlane.f32.xlu1 %v433_v60 }
 0x148   : > { %439 = vadd.xlane.f32.xlu0 %v434_v61 }
 0x149   : > { %419 = vadd.xlane.f32.xlu1 %v413_v62 }
 0x14c   : > { %441 = vadd.xlane.f32.xlu0 %v435_v63 }
 0x14d   : > { %421 = vadd.xlane.f32.xlu1 %v414_v0 }
 0x150   : > { %443 = vadd.xlane.f32.xlu0 %v436_v1 }
 0x1c1   : > { %v392_v2 = vpop.xlane.xlu1 %391 }
 0x1c2   : > { %703 = vlog2.f32 %v392_v2 }
 0x1c5   : > { %v394_v3 = vpop.xlane.xlu0 %393 }
 0x1c6   : > { %v396_v4 = vpop.xlane.xlu1 %395  ;;  %705 = vlog2.f32 %v394_v3 }
 0x1c7   : > { %707 = vlog2.f32 %v396_v4 }
 0x1c9   : > { %v398_v5 = vpop.xlane.xlu0 %397 }
 0x1ca   : > { %709 = vlog2.f32 %v398_v5  ;;  %v416_v6 = vpop.xlane.xlu1 %415 }
 0x1cd   : > { %v418_v8 = vpop.xlane.xlu0 %417 }
 0x1ce   : > { %v438_v10 = vpop.xlane.xlu1 %437 }
 0x1cf   : > { %v704_v9 = vpop.eup %703  ;;  %v445_v19 = vsel %vm337_vm2, %v438_v10, 0.0 }
 0x1d0   : > { %v400_v11 = vmul.f32 0.6931472, %v704_v9  ;;  %v470_v28 = vsel %vm453_vm8, %v445_v19, 0.0 }
 0x1d1   : > { %v440_v12 = vpop.xlane.xlu0 %439 }
 0x1d2   : > { %v407_v13 = vadd.f32 %v400_v11, %v372_v41  ;;  %v446_v7 = vsel %vm338_vm5, %v440_v12, 0.0  ;;  %v420_v22 = vpop.xlane.xlu1 %419 }
 0x1d3   : > { %v706_v15 = vpop.eup %705  ;;  %v471_v21 = vsel %vm453_vm8, %v446_v7, 0.0 }
 0x1d4   : > { %v708_v16 = vpop.eup %707  ;;  %v402_v17 = vmul.f32 0.6931472, %v706_v15  ;;  %v423_v18 = vsub.f32 %v407_v13, %v416_v6  ;;  %v472_v33 = vadd.f32 %v471_v21, %v470_v28 }
 0x1d5   : > { %v404_v20 = vmul.f32 0.6931472, %v708_v16  ;;  %v442_v23 = vpop.xlane.xlu0 %441 }
 0x1d6   : > { %v408_v24 = vadd.f32 %v402_v17, %v941_v44  ;;  %v447_v27 = vsel %vm339_vm6, %v442_v23, 0.0  ;;  %v449_v32 = vmul.f32 %v445_v19, %v423_v18  ;;  %v422_v41 = vpop.xlane.xlu1 %421 }
 0x1d7   : > { %v710_v25 = vpop.eup %709  ;;  %v409_v29 = vadd.f32 %v404_v20, %v943_v45  ;;  %v473_v30 = vsel %vm453_vm8, %v447_v27, 0.0 }
 0x1d8   : > { %v406_v31 = vmul.f32 0.6931472, %v710_v25  ;;  %v424_v14 = vsub.f32 %v408_v24, %v418_v8  ;;  %v474_v38 = vadd.f32 %v473_v30, %v472_v33  ;;  %v454_v43 = vsel %vm453_vm8, %v449_v32, 0.0 }
 0x1d9   : > { %v425_v34 = vsub.f32 %v409_v29, %v420_v22  ;;  %v444_v36 = vpop.xlane.xlu0 %443 }
 0x1da   : > { %v450_v37 = vmul.f32 %v446_v7, %v424_v14  ;;  %v410_v39 = vadd.f32 %v406_v31, %v947_v50  ;;  %v448_v26 = vsel %vm340_vm7, %v444_v36, 0.0 }
 0x1db   : > { %v451_v40 = vmul.f32 %v447_v27, %v425_v34  ;;  %v475_v42 = vsel %vm453_vm8, %v448_v26, 0.0 }
 0x1dc   : > { %v455_v44 = vsel %vm453_vm8, %v450_v37, 0.0  ;;  %v426_v45 = vsub.f32 %v410_v39, %v422_v41  ;;  %v476_v46 = vadd.f32 %v475_v42, %v474_v38 }
 0x1dd   : > { %v456_v47 = vadd.f32 %v455_v44, %v454_v43  ;;  %v457_v48 = vsel %vm453_vm8, %v451_v40, 0.0 }
 0x1de   : > { %v452_v49 = vmul.f32 %v448_v26, %v426_v45  ;;  %477 = vadd.xlane.f32.xlu0 %v476_v46 }
 0x1df   : > { %v458_v51 = vadd.f32 %v457_v48, %v456_v47 }
 0x1e0   : > { %v459_v50 = vsel %vm453_vm8, %v452_v49, 0.0 }
 0x1e1   : > { %v460_v35 = vadd.f32 %v459_v50, %v458_v51 }
 0x1e3   : > { %461 = vadd.xlane.f32.xlu1 %v460_v35 }
 0x267   : > { %v478_v52 = vpop.xlane.xlu0 %477 }
 0x268   : > { %v479_v53 = vrot.slane %v478_v52, 4 }
 0x26a   : > { %v480_v54 = vadd.f32 %v479_v53, %v478_v52 }
 0x26c   : > { %v481_v55 = vrot.slane %v480_v54, 2  ;;  %v462_v56 = vpop.xlane.xlu1 %461 }
 0x26d   : > { %v463_v57 = vrot.slane %v462_v56, 4 }
 0x26e   : > { %v482_v59 = vadd.f32 %v481_v55, %v480_v54 }
 0x26f   : > { %v464_v58 = vadd.f32 %v463_v57, %v462_v56 }
 0x270   : > { %v483_v62 = vrot.slane %v482_v59, 1 }
 0x271   : > { %v465_v60 = vrot.slane %v464_v58, 2 }
 0x272   : > { %v484_v1 = vadd.f32 %v483_v62, %v482_v59 }
 0x273   : > { %v466_v61 = vadd.f32 %v465_v60, %v464_v58 }
 0x275   : > { %v467_v63 = vrot.slane %v466_v61, 1 }
 0x277   : > { %v468_v0 = vadd.f32 %v467_v63, %v466_v61 }
 0x279   : > { %644 = vpush %v468_v0 }
 0x27a   : > { %646 = vpush %v484_v1 }
 0x2aa   : > { %s645_s12 = spop %644 }
 0x2ab   : > { %v486_v2 = vstv %s645_s12  ;;  %s647_s13 = spop %646 }
 0x2ac   : > { %487 = vst [vmem:[%s262_s6] sm:$0xff] %v486_v2  ;;  %v488_v3 = vstv %s647_s13 }
 0x2ad   : > { %489 = vst [vmem:[%s269_s26] sm:$0xff] %v488_v3 }
 0x2ae   : > { %724 = shalt.err (!%p721_p3)
}
 0x2af   : > { %s725_s26 = scalar_lea.hbm %s1004_s11, 128  ;;  %s729_s12 = scalar_lea.hbm %s1076_s4, 384 }
 0x2b0   : > { %p726_p4 = scmp.ne.s32.totalorder %s1004_s11, %s725_s26  ;;  %p730_p9 = scmp.lt.s32.totalorder %s1004_s11, %s1076_s4 }
 0x2b1   : > { %p731_p10 = scmp.lt.s32.totalorder %s729_s12, %s725_s26 }
 0x2b2   : > { %p727_p7 = pnand %p726_p4, %p874_p5 }
 0x2b3   : > { %p732_p11 = por %p731_p10, %p730_p9 }
 0x2b4   : > { %p728_p8 = pneg %p727_p7 }
 0x2b6   : > { %p733_p12 = pnand %p732_p11, %p728_p8 }
 0x2b8   : > { %736 = shalt.err (!%p733_p12)
}
 0x2b9   : > { %648 = dma.vmem_to_hbm [thread:$0]  (%p874_p5), %s1006_s7, 128, %s1004_s11, %s491_s22  }
 0x2ba   : > { %s496_s15 = scalar_lea.sflag [#allocation5], %s995_s23  ;;  %s737_s17 = scalar_lea.vmem %s999_s30, 128 }
 0x2bb   : > { %p738_p13 = scmp.ne.s32.totalorder %s999_s30, %s737_s17  ;;  %s805_s25 = smov [#allocation4]  }
 0x2bc   : > { %s741_s9 = sshll.u32 %s805_s25, 4  ;;  %s742_s9 = int_to_ptr.vmem [resolvable:$false] %s741_s9 }
 0x2bd   : > { %p739_p0 = pnand %p738_p13, %p874_p5  ;;  %s743_s10 = scalar_lea.vmem %s742_s9, 256 }
 0x2be   : > { %p744_p2 = scmp.lt.s32.totalorder %s999_s30, %s742_s9  ;;  %p745_p3 = scmp.lt.s32.totalorder %s743_s10, %s737_s17 }
 0x2bf   : > { %p740_p1 = pneg %p739_p0 }
 0x2c0   : > { %p746_p4 = por %p745_p3, %p744_p2 }
 0x2c2   : > { %p747_p7 = pnand %p746_p4, %p740_p1 }
 0x2c4   : > { %750 = shalt.err (!%p747_p7)
}
 0x2c5   : > { %s751_s7 = scalar_lea.hbm %s1011_s16, 128  ;;  %s755_s22 = scalar_lea.hbm %s1077_s5, 384 }
 0x2c6   : > { %p752_p8 = scmp.ne.s32.totalorder %s1011_s16, %s751_s7  ;;  %p756_p11 = scmp.lt.s32.totalorder %s1011_s16, %s1077_s5 }
 0x2c7   : > { %p757_p12 = scmp.lt.s32.totalorder %s755_s22, %s751_s7 }
 0x2c8   : > { %p753_p9 = pnand %p752_p8, %p874_p5 }
 0x2c9   : > { %p758_p13 = por %p757_p12, %p756_p11 }
 0x2ca   : > { %p754_p10 = pneg %p753_p9 }
 0x2cc   : > { %p759_p0 = pnand %p758_p13, %p754_p10 }
 0x2ce   : > { %762 = shalt.err (!%p759_p0)
}
 0x2cf   : > { %649 = dma.vmem_to_hbm [thread:$0]  (%p874_p5), %s999_s30, 128, %s1011_s16, %s496_s15  }
 0x2d0 PF: > { %p659_p1 = scmp.ge.s32.totalorder %s801_s21, 2  ;;  %s534_s8 = sand.u32 1, %s789_s18  }
 0x2d1   : > { %s535_s12 = scalar_lea.sflag [#allocation3], %s534_s8 }
 0x2d2   : > { %p653_p2 = pnand %p659_p1, %p878_p6 }
 0x2d4   : > { %p654_p3 = pneg %p653_p2 }
 0x2d6   : > { %780 = dma.done.wait (%p654_p3), %s535_s12, 128  }
 0x2d7   : > { %782 = vsyncadd (%p654_p3), %s535_s12, 4294967168  ;;  %s544_s13 = scalar_lea.sflag [#allocation5], %s534_s8 }
 0x2d8   : > { %784 = dma.done.wait (%p654_p3), %s544_s13, 128  }
 0x2d9   : > { %786 = vsyncadd (%p654_p3), %s544_s13, 4294967168  ;;  %p19_p5 = scmp.ge.s32.totalorder %s861_s24, 5   ;;  %s1080_s18 = smov %s793_s19 }
 0x2da   : > { %s1081_s19 = smov %s797_s20  ;;  %s1082_s20 = smov %s872_s27 }
 0x2db   : > { %s1083_s21 = smov %s861_s24  ;;  %21 = sbr.rel (!%p19_p5) target bundleno = 5 (0x5), region = 91 }
 0x2e0   :  { %549 = vsyncpa [#allocation3], 1 }
 0x2e1   :  { %551 = vsyncpa [#allocation3 + $0x1], 1 }
 0x2e2   :  { %552 = vsyncpa [#allocation5], 1 }
 0x2e3   :  { %554 = vsyncpa [#allocation5 + $0x1], 1 }

</bundles_post_ra>
